<compile_context>
chip_gen: v5e
topology: v5e:2x2
jax: 0.10.0
libtpu: 0.0.40
codegen_flags: <defaults>
</compile_context>

<pallas_src>
import functools

import jax
import jax.numpy as jnp
from jax.experimental import pallas as pl
from jax.experimental.pallas import tpu as pltpu

_LANES = 128
_CHUNK_ROWS = 32   # multiple of 8 (f32) and 16 (bf16) sublanes


def _round_up(x, m):
    return ((x + m - 1) // m) * m


def _fusion_kernel(w_ref, b_ref, x_ref, d_ref, o_ref, *, chunk):
    # w_ref: SMEM (Cout, Cin)  BN-folded 1x1 conv weights (scale already folded in)
    # b_ref: SMEM (Cout,)      BN shift = beta - mean * scale
    # x_ref: VMEM (1, Cx, tr, 128)   spatial tile of x     (NCHW, H*W flattened)
    # d_ref: VMEM (1, Cd, tr, 128)   spatial tile of depth
    # o_ref: VMEM (1, Cout, tr, 128)
    cx = x_ref.shape[1]
    cd = d_ref.shape[1]
    cin = cx + cd
    cout = o_ref.shape[1]
    tr = x_ref.shape[2]

    # Hoist the 12 weights + 3 shifts (SMEM scalar reads) out of the chunk loop.
    w = [[w_ref[o, c] for c in range(cin)] for o in range(cout)]
    b = [b_ref[o] for o in range(cout)]

    def emit(rows):
        # Channel order matches torch.cat([x, depth], dim=1): x channels, then depth.
        chans = ([x_ref[0, c, rows, :].astype(jnp.float32) for c in range(cx)]
                 + [d_ref[0, c, rows, :].astype(jnp.float32) for c in range(cd)])
        for o in range(cout):                      # Cout = 3, unrolled at trace time
            acc = b[o] + w[o][0] * chans[0]
            for c in range(1, cin):                # 12 broadcast-FMAs total on the VPU
                acc = acc + w[o][c] * chans[c]
            o_ref[0, o, rows, :] = acc.astype(o_ref.dtype)

    if chunk == tr:
        emit(slice(None))
    else:
        # Chunked so every intermediate is a handful of live vregs (f32 accumulation)
        # instead of full (tr,128) VMEM temporaries.
        def body(j, carry):
            r0 = pl.multiple_of(j * chunk, chunk)
            emit(pl.ds(r0, chunk))
            return carry

        jax.lax.fori_loop(0, tr // chunk, body, 0)


def _conv1x1_bn(x, depth, w_folded, shift, *, ts_max=256 * 1024):
    """x: (N, Cx, H, W), depth: (N, Cd, H, W) -> (N, Cout, H, W); NCHW, f32 or bf16."""
    N, Cx, H, W = x.shape
    Cd = depth.shape[1]
    Cout = w_folded.shape[0]
    S = H * W
    out_dtype = x.dtype

    n_rows = pl.cdiv(S, _LANES)                   # 128-pixel rows needed

    if n_rows <= _CHUNK_ROWS:
        # Tiny spatial: single tile; pad rows to the dtype's sublane tile so the
        # block layout is trivially legal. Cost is negligible at this size.
        sub = 8 if jnp.dtype(out_dtype).itemsize >= 4 else 16
        Sp = _round_up(S, _LANES * sub)
        n128 = Sp // _LANES
        nt, tr, chunk = 1, n128, n128
    else:
        # Pad only to a 128-lane multiple (usually a no-op); ragged last tiles are
        # handled as Pallas partial blocks (OOB reads unused, OOB writes dropped),
        # so there is no ts-sized rounding and no full-array pad/slice copy.
        Sp = _round_up(S, _LANES)
        n128 = Sp // _LANES
        max_tr = max(_CHUNK_ROWS, (ts_max // _LANES) // _CHUNK_ROWS * _CHUNK_ROWS)
        nt = pl.cdiv(n128, max_tr)
        # v7x: 2 TensorCores shard the "parallel" grid axes -> keep N*nt even.
        if (N * nt) % 2 == 1:
            nt += 1
        tr = _CHUNK_ROWS * pl.cdiv(pl.cdiv(n128, nt), _CHUNK_ROWS)
        tr = min(tr, (n128 // _CHUNK_ROWS) * _CHUNK_ROWS)   # block never exceeds array
        nt = pl.cdiv(n128, tr)                    # last tile may be partial
        chunk = _CHUNK_ROWS

    xr = x.reshape(N, Cx, S)
    dr = depth.reshape(N, Cd, S)
    if Sp != S:
        xr = jnp.pad(xr, ((0, 0), (0, 0), (0, Sp - S)))
        dr = jnp.pad(dr, ((0, 0), (0, 0), (0, Sp - S)))
    xr = xr.reshape(N, Cx, n128, _LANES)          # contiguous (free) reshape
    dr = dr.reshape(N, Cd, n128, _LANES)

    out = pl.pallas_call(
        functools.partial(_fusion_kernel, chunk=chunk),
        out_shape=jax.ShapeDtypeStruct((N, Cout, n128, _LANES), out_dtype),
        grid=(N, nt),
        in_specs=[
            pl.BlockSpec(memory_space=pltpu.MemorySpace.SMEM),   # w_folded (Cout, Cin)
            pl.BlockSpec(memory_space=pltpu.MemorySpace.SMEM),   # shift    (Cout,)
            pl.BlockSpec((1, Cx, tr, _LANES), lambda n, s: (n, 0, s, 0)),
            pl.BlockSpec((1, Cd, tr, _LANES), lambda n, s: (n, 0, s, 0)),
        ],
        out_specs=pl.BlockSpec((1, Cout, tr, _LANES), lambda n, s: (n, 0, s, 0)),
        compiler_params=pltpu.CompilerParams(
            dimension_semantics=("parallel", "parallel"),
            vmem_limit_bytes=48 * 1024 * 1024,
        ),
    )(w_folded, shift, xr, dr)

    y = out.reshape(N, Cout, Sp)
    if Sp != S:
        y = y[:, :, :S]
    return y.reshape(N, Cout, H, W)


def early_fusion_conv(x, depth, params):
    """x: (N,3,H,W), depth: (N,1,H,W), NCHW (f32 or bf16) -> (N,3,H,W) in x.dtype."""
    w = params["conv_w"]
    if w.ndim == 4:                               # (Cout, Cin, 1, 1) checkpoint layout
        w = w.reshape(w.shape[0], w.shape[1])
    gamma = params["bn_gamma"].astype(jnp.float32)
    beta = params["bn_beta"].astype(jnp.float32)
    mean = params["bn_mean"].astype(jnp.float32)
    var = params["bn_var"].astype(jnp.float32)
    eps = params["bn_eps"]

    # Fold eval-mode BatchNorm into the conv: y = (w*scale) @ [x; depth] + shift.
    scale = gamma / jnp.sqrt(var + eps)                       # (Cout,)
    shift = (beta - mean * scale).astype(jnp.float32)         # (Cout,)
    w_folded = (w.astype(jnp.float32) * scale[:, None])       # (Cout, Cin)

    depth = depth.astype(x.dtype)
    # BasicConv2d defines a ReLU but does not apply it in forward -> no ReLU here.
    return _conv1x1_bn(x, depth, w_folded, shift)


def make_params(in_channel=4, out_channel=3):
    # Deterministic synthetic parameters (shapes from nn.Conv2d(4,3,1,bias=False)
    # and nn.BatchNorm2d(3)); not a checkpoint load.
    key = jax.random.PRNGKey(42)
    kw, km, kv = jax.random.split(key, 3)
    conv_w = jax.random.normal(kw, (out_channel, in_channel), jnp.float32) * 0.1
    bn_gamma = jnp.linspace(0.9, 1.1, out_channel).astype(jnp.float32)
    bn_beta = jnp.linspace(-0.1, 0.1, out_channel).astype(jnp.float32)
    bn_mean = jax.random.normal(km, (out_channel,), jnp.float32) * 0.05
    bn_var = jnp.abs(jax.random.normal(kv, (out_channel,), jnp.float32)) * 0.1 + 1.0
    return {
        "conv_w": conv_w,
        "bn_gamma": bn_gamma,
        "bn_beta": bn_beta,
        "bn_mean": bn_mean,
        "bn_var": bn_var,
        "bn_eps": 1e-5,
    }


def reference(x, depth, params):
    # Pure-JAX (f32) reference of the same math.
    xin = jnp.concatenate([x, depth], axis=1)                 # (N, Cin, H, W)
    w = params["conv_w"]
    if w.ndim == 4:
        w = w.reshape(w.shape[0], w.shape[1])
    y = jnp.einsum("nchw,oc->nohw", xin, w)
    s = params["bn_gamma"] / jnp.sqrt(params["bn_var"] + params["bn_eps"])
    b = params["bn_beta"] - params["bn_mean"] * s
    return y * s[None, :, None, None] + b[None, :, None, None]


if __name__ == "__main__":
    params = make_params(in_channel=4, out_channel=3)
    k1, k2, k3, k4, k5, k6 = jax.random.split(jax.random.PRNGKey(0), 6)

    # Test 1: f32, tiny spatial (S=256 -> single sublane-padded tile).
    x = jax.random.normal(k1, (2, 3, 16, 16), jnp.float32)
    d = jax.random.normal(k2, (2, 1, 16, 16), jnp.float32)
    out = jax.block_until_ready(early_fusion_conv(x, d, params))
    ref = reference(x, d, params)
    assert out.shape == (2, 3, 16, 16) and out.dtype == jnp.float32
    assert jnp.allclose(out, ref, rtol=1e-5, atol=1e-5)

    # Test 2: f32, spatial not divisible by the tile (96x96 -> 72 rows, ragged
    # last tile handled as a partial block; no pad / slice copies).
    x = jax.random.normal(k3, (1, 3, 96, 96), jnp.float32)
    d = jax.random.normal(k4, (1, 1, 96, 96), jnp.float32)
    out = jax.block_until_ready(early_fusion_conv(x, d, params))
    ref = reference(x, d, params)
    assert out.shape == (1, 3, 96, 96)
    assert jnp.allclose(out, ref, rtol=1e-5, atol=1e-5)

    # Test 3: bf16 I/O (f32 accumulation in-kernel), even grid split for N=1.
    x = jax.random.normal(k5, (1, 3, 128, 128), jnp.float32).astype(jnp.bfloat16)
    d = jax.random.normal(k6, (1, 1, 128, 128), jnp.float32).astype(jnp.bfloat16)
    out = jax.block_until_ready(early_fusion_conv(x, d, params))
    ref = reference(x.astype(jnp.float32), d.astype(jnp.float32), params)
    assert out.shape == (1, 3, 128, 128) and out.dtype == jnp.bfloat16
    assert jnp.allclose(out.astype(jnp.float32), ref, rtol=2e-2, atol=2e-2)

    print("KERNEL_OK")
</pallas_src>

<mosaic_0001>
module attributes {stable_mosaic.version = 11 : i64} {
  func.func @_fusion_kernel(%arg0: i32, %arg1: i32, %arg2: memref<3x4xf32, #tpu.memory_space<smem>>, %arg3: memref<3xf32, #tpu.memory_space<smem>>, %arg4: memref<1x3x8x128xf32, #tpu.memory_space<vmem>>, %arg5: memref<1x1x8x128xf32, #tpu.memory_space<vmem>>, %arg6: memref<1x3x8x128xf32, #tpu.memory_space<vmem>>) attributes {dimension_semantics = [#tpu.dimension_semantics<parallel>, #tpu.dimension_semantics<parallel>], iteration_bounds = array<i64: 2, 1>, scalar_prefetch = 0 : i64, scratch_operands = 0 : i64, tpu.core_type = #tpu.core_type<tc>, window_params = [{transform_indices = @transform_0, window_bounds = array<i64: 3, 4>}, {transform_indices = @transform_1, window_bounds = array<i64: 3>}, {transform_indices = @transform_2, window_bounds = array<i64: 1, 3, 8, 128>}, {transform_indices = @transform_3, window_bounds = array<i64: 1, 1, 8, 128>}, {transform_indices = @transform_4, window_bounds = array<i64: 1, 3, 8, 128>}]} {
    %c0 = arith.constant 0 : index
    %c0_0 = arith.constant 0 : index
    %0 = memref.load %arg2[%c0, %c0_0] : memref<3x4xf32, #tpu.memory_space<smem>>
    %c0_1 = arith.constant 0 : index
    %c1 = arith.constant 1 : index
    %1 = memref.load %arg2[%c0_1, %c1] : memref<3x4xf32, #tpu.memory_space<smem>>
    %c0_2 = arith.constant 0 : index
    %c2 = arith.constant 2 : index
    %2 = memref.load %arg2[%c0_2, %c2] : memref<3x4xf32, #tpu.memory_space<smem>>
    %c0_3 = arith.constant 0 : index
    %c3 = arith.constant 3 : index
    %3 = memref.load %arg2[%c0_3, %c3] : memref<3x4xf32, #tpu.memory_space<smem>>
    %c1_4 = arith.constant 1 : index
    %c0_5 = arith.constant 0 : index
    %4 = memref.load %arg2[%c1_4, %c0_5] : memref<3x4xf32, #tpu.memory_space<smem>>
    %c1_6 = arith.constant 1 : index
    %c1_7 = arith.constant 1 : index
    %5 = memref.load %arg2[%c1_6, %c1_7] : memref<3x4xf32, #tpu.memory_space<smem>>
    %c1_8 = arith.constant 1 : index
    %c2_9 = arith.constant 2 : index
    %6 = memref.load %arg2[%c1_8, %c2_9] : memref<3x4xf32, #tpu.memory_space<smem>>
    %c1_10 = arith.constant 1 : index
    %c3_11 = arith.constant 3 : index
    %7 = memref.load %arg2[%c1_10, %c3_11] : memref<3x4xf32, #tpu.memory_space<smem>>
    %c2_12 = arith.constant 2 : index
    %c0_13 = arith.constant 0 : index
    %8 = memref.load %arg2[%c2_12, %c0_13] : memref<3x4xf32, #tpu.memory_space<smem>>
    %c2_14 = arith.constant 2 : index
    %c1_15 = arith.constant 1 : index
    %9 = memref.load %arg2[%c2_14, %c1_15] : memref<3x4xf32, #tpu.memory_space<smem>>
    %c2_16 = arith.constant 2 : index
    %c2_17 = arith.constant 2 : index
    %10 = memref.load %arg2[%c2_16, %c2_17] : memref<3x4xf32, #tpu.memory_space<smem>>
    %c2_18 = arith.constant 2 : index
    %c3_19 = arith.constant 3 : index
    %11 = memref.load %arg2[%c2_18, %c3_19] : memref<3x4xf32, #tpu.memory_space<smem>>
    %c0_20 = arith.constant 0 : index
    %12 = memref.load %arg3[%c0_20] : memref<3xf32, #tpu.memory_space<smem>>
    %c1_21 = arith.constant 1 : index
    %13 = memref.load %arg3[%c1_21] : memref<3xf32, #tpu.memory_space<smem>>
    %c2_22 = arith.constant 2 : index
    %14 = memref.load %arg3[%c2_22] : memref<3xf32, #tpu.memory_space<smem>>
    %c0_23 = arith.constant 0 : index
    %c0_24 = arith.constant 0 : index
    %c0_25 = arith.constant 0 : index
    %c0_26 = arith.constant 0 : index
    %15 = vector.load %arg4[%c0_23, %c0_24, %c0_25, %c0_26] : memref<1x3x8x128xf32, #tpu.memory_space<vmem>>, vector<1x1x8x128xf32>
    %16 = vector.shape_cast %15 : vector<1x1x8x128xf32> to vector<8x128xf32>
    %c0_27 = arith.constant 0 : index
    %c1_28 = arith.constant 1 : index
    %c0_29 = arith.constant 0 : index
    %c0_30 = arith.constant 0 : index
    %17 = vector.load %arg4[%c0_27, %c1_28, %c0_29, %c0_30] : memref<1x3x8x128xf32, #tpu.memory_space<vmem>>, vector<1x1x8x128xf32>
    %18 = vector.shape_cast %17 : vector<1x1x8x128xf32> to vector<8x128xf32>
    %c0_31 = arith.constant 0 : index
    %c2_32 = arith.constant 2 : index
    %c0_33 = arith.constant 0 : index
    %c0_34 = arith.constant 0 : index
    %19 = vector.load %arg4[%c0_31, %c2_32, %c0_33, %c0_34] : memref<1x3x8x128xf32, #tpu.memory_space<vmem>>, vector<1x1x8x128xf32>
    %20 = vector.shape_cast %19 : vector<1x1x8x128xf32> to vector<8x128xf32>
    %c0_35 = arith.constant 0 : index
    %c0_36 = arith.constant 0 : index
    %c0_37 = arith.constant 0 : index
    %c0_38 = arith.constant 0 : index
    %21 = vector.load %arg5[%c0_35, %c0_36, %c0_37, %c0_38] : memref<1x1x8x128xf32, #tpu.memory_space<vmem>>, vector<1x1x8x128xf32>
    %22 = vector.shape_cast %21 : vector<1x1x8x128xf32> to vector<8x128xf32>
    %23 = vector.broadcast %0 : f32 to vector<8x128xf32>
    %24 = arith.mulf %23, %16 : vector<8x128xf32>
    %25 = vector.broadcast %12 : f32 to vector<8x128xf32>
    %26 = arith.addf %25, %24 : vector<8x128xf32>
    %27 = vector.broadcast %1 : f32 to vector<8x128xf32>
    %28 = arith.mulf %27, %18 : vector<8x128xf32>
    %29 = arith.addf %26, %28 : vector<8x128xf32>
    %30 = vector.broadcast %2 : f32 to vector<8x128xf32>
    %31 = arith.mulf %30, %20 : vector<8x128xf32>
    %32 = arith.addf %29, %31 : vector<8x128xf32>
    %33 = vector.broadcast %3 : f32 to vector<8x128xf32>
    %34 = arith.mulf %33, %22 : vector<8x128xf32>
    %35 = arith.addf %32, %34 : vector<8x128xf32>
    %c0_39 = arith.constant 0 : index
    %c0_40 = arith.constant 0 : index
    %c0_41 = arith.constant 0 : index
    %c0_42 = arith.constant 0 : index
    %36 = vector.load %arg6[%c0_39, %c0_40, %c0_41, %c0_42] : memref<1x3x8x128xf32, #tpu.memory_space<vmem>>, vector<1x1x8x128xf32>
    %37 = vector.shape_cast %36 : vector<1x1x8x128xf32> to vector<8x128xf32>
    %38 = vector.shape_cast %35 : vector<8x128xf32> to vector<1x1x8x128xf32>
    tpu.vector_store %arg6[%c0_39, %c0_40, %c0_41, %c0_42], %38 {strides = array<i32>} : memref<1x3x8x128xf32, #tpu.memory_space<vmem>>, vector<1x1x8x128xf32>,
    %39 = vector.broadcast %4 : f32 to vector<8x128xf32>
    %40 = arith.mulf %39, %16 : vector<8x128xf32>
    %41 = vector.broadcast %13 : f32 to vector<8x128xf32>
    %42 = arith.addf %41, %40 : vector<8x128xf32>
    %43 = vector.broadcast %5 : f32 to vector<8x128xf32>
    %44 = arith.mulf %43, %18 : vector<8x128xf32>
    %45 = arith.addf %42, %44 : vector<8x128xf32>
    %46 = vector.broadcast %6 : f32 to vector<8x128xf32>
    %47 = arith.mulf %46, %20 : vector<8x128xf32>
    %48 = arith.addf %45, %47 : vector<8x128xf32>
    %49 = vector.broadcast %7 : f32 to vector<8x128xf32>
    %50 = arith.mulf %49, %22 : vector<8x128xf32>
    %51 = arith.addf %48, %50 : vector<8x128xf32>
    %c0_43 = arith.constant 0 : index
    %c1_44 = arith.constant 1 : index
    %c0_45 = arith.constant 0 : index
    %c0_46 = arith.constant 0 : index
    %52 = vector.load %arg6[%c0_43, %c1_44, %c0_45, %c0_46] : memref<1x3x8x128xf32, #tpu.memory_space<vmem>>, vector<1x1x8x128xf32>
    %53 = vector.shape_cast %52 : vector<1x1x8x128xf32> to vector<8x128xf32>
    %54 = vector.shape_cast %51 : vector<8x128xf32> to vector<1x1x8x128xf32>
    tpu.vector_store %arg6[%c0_43, %c1_44, %c0_45, %c0_46], %54 {strides = array<i32>} : memref<1x3x8x128xf32, #tpu.memory_space<vmem>>, vector<1x1x8x128xf32>,
    %55 = vector.broadcast %8 : f32 to vector<8x128xf32>
    %56 = arith.mulf %55, %16 : vector<8x128xf32>
    %57 = vector.broadcast %14 : f32 to vector<8x128xf32>
    %58 = arith.addf %57, %56 : vector<8x128xf32>
    %59 = vector.broadcast %9 : f32 to vector<8x128xf32>
    %60 = arith.mulf %59, %18 : vector<8x128xf32>
    %61 = arith.addf %58, %60 : vector<8x128xf32>
    %62 = vector.broadcast %10 : f32 to vector<8x128xf32>
    %63 = arith.mulf %62, %20 : vector<8x128xf32>
    %64 = arith.addf %61, %63 : vector<8x128xf32>
    %65 = vector.broadcast %11 : f32 to vector<8x128xf32>
    %66 = arith.mulf %65, %22 : vector<8x128xf32>
    %67 = arith.addf %64, %66 : vector<8x128xf32>
    %c0_47 = arith.constant 0 : index
    %c2_48 = arith.constant 2 : index
    %c0_49 = arith.constant 0 : index
    %c0_50 = arith.constant 0 : index
    %68 = vector.load %arg6[%c0_47, %c2_48, %c0_49, %c0_50] : memref<1x3x8x128xf32, #tpu.memory_space<vmem>>, vector<1x1x8x128xf32>
    %69 = vector.shape_cast %68 : vector<1x1x8x128xf32> to vector<8x128xf32>
    %70 = vector.shape_cast %67 : vector<8x128xf32> to vector<1x1x8x128xf32>
    tpu.vector_store %arg6[%c0_47, %c2_48, %c0_49, %c0_50], %70 {strides = array<i32>} : memref<1x3x8x128xf32, #tpu.memory_space<vmem>>, vector<1x1x8x128xf32>,
    return
  }
  func.func @transform_0(%arg0: i32, %arg1: i32) -> (i32, i32) {
    %c0_i32 = arith.constant 0 : i32
    %c0_i32_0 = arith.constant 0 : i32
    %c0_i32_1 = arith.constant 0 : i32
    return %c0_i32, %c0_i32_0 : i32, i32
  }
  func.func @transform_1(%arg0: i32, %arg1: i32) -> i32 {
    %c0_i32 = arith.constant 0 : i32
    %c0_i32_0 = arith.constant 0 : i32
    return %c0_i32 : i32
  }
  func.func @transform_2(%arg0: i32, %arg1: i32) -> (i32, i32, i32, i32) {
    %c0_i32 = arith.constant 0 : i32
    %c0_i32_0 = arith.constant 0 : i32
    %c0_i32_1 = arith.constant 0 : i32
    return %arg0, %c0_i32, %arg1, %c0_i32_0 : i32, i32, i32, i32
  }
  func.func @transform_3(%arg0: i32, %arg1: i32) -> (i32, i32, i32, i32) {
    %c0_i32 = arith.constant 0 : i32
    %c0_i32_0 = arith.constant 0 : i32
    %c0_i32_1 = arith.constant 0 : i32
    return %arg0, %c0_i32, %arg1, %c0_i32_0 : i32, i32, i32, i32
  }
  func.func @transform_4(%arg0: i32, %arg1: i32) -> (i32, i32, i32, i32) {
    %c0_i32 = arith.constant 0 : i32
    %c0_i32_0 = arith.constant 0 : i32
    %c0_i32_1 = arith.constant 0 : i32
    return %arg0, %c0_i32, %arg1, %c0_i32_0 : i32, i32, i32, i32
  }
}

</mosaic_0001>

<bundles_post_ra>
// kernel: tpu_custom_call.1
= control target key start
LH: loop header
LB: loop body
LE: loop exit
PB: predicated region body
PF: predicated region fallthrough
CT: control target
= control target key end

     0   :  { %s1046_s0 = inlined_call_operand.hbm [shape: f32[3,4], index: 0, kind: input, shape index: {}]   ;;  %s1047_s1 = inlined_call_operand.hbm [shape: f32[3], index: 1, kind: input, shape index: {}]   ;;  %s1048_s2 = inlined_call_operand.hbm [shape: f32[2,3,8,128], index: 2, kind: input, shape index: {}]   ;;  %s1049_s3 = inlined_call_operand.hbm [shape: f32[2,1,8,128], index: 3, kind: input, shape index: {}]   ;;  %s1050_s4 = inlined_call_operand.hbm [shape: f32[2,3,8,128], index: 4, kind: output, shape index: {}]  }
   0x1   :  { %1052 = sst [smem:[#allocation18_spill]] %s1046_s0 }
   0x2   :  { %1053 = sst [smem:[#allocation19_spill]] %s1047_s1 }
   0x3   :  { %1054 = sst [smem:[#allocation20_spill]] %s1048_s2 }
   0x4   :  { %9 = vsyncpa [#allocation5], 0 }
   0x5   :  { %10 = vsyncpa [#allocation7], 0 }
   0x6   :  { %11 = vsyncpa [#allocation3], 0 }
   0x7   :  { %13 = vsyncpa [#allocation3 + $0x1], 0 }
   0x8   :  { %14 = vsyncpa [#allocation10], 0 }
   0x9   :  { %16 = vsyncpa [#allocation10 + $0x1], 0 }
   0xa   :  { %17 = vsyncpa [#allocation4], 0 }
   0xb   :  { %19 = vsyncpa [#allocation4 + $0x1], 0  ;;  %s863_s15 = smov 0   ;;  %s865_s16 = smov 0  }
   0xc   :  { %s867_s17 = smov 0   ;;  %s869_s18 = smov 0  }
   0xd   :  { %s871_s19 = smov 0   ;;  %s873_s20 = smov 0  }
   0xe LB: > { %s517_s21 = sadd.s32 4294967295, %s830_s20   ;;  %s518_s22 = sadd.s32 4294967294, %s830_s20   ;;  %s830_s20 = sphi %s873_s20, %s25_s20   ;;  %s826_s19 = sphi %s871_s19, %s1071_s19   ;;  %s822_s18 = sphi %s869_s18, %s1070_s18   ;;  %s818_s17 = sphi %s867_s17, %s1069_s17   ;;  %s814_s16 = sphi %s865_s16, %s1068_s16   ;;  %s810_s15 = sphi %s863_s15, %s1067_s15  }
   0xf   : > { %s88_s23 = sadd.s32 1, %s818_s17  ;;  %p95_p0 = scmp.ne.s32.totalorder %s818_s17, %s814_s16 }
  0x10   : > { %p96_p1 = scmp.eq.s32.totalorder %s830_s20, 0  ;;  %p101_p2 = scmp.ne.s32.totalorder %s814_s16, %s810_s15 }
  0x11   : > { %p901_p3 = scmp.eq.s32.totalorder %s517_s21, 0  ;;  %p155_p4 = scmp.eq.s32.totalorder %s517_s21, 1 }
  0x12   : > { %p905_p5 = por %p96_p1, %p95_p0  ;;  %p161_p6 = scmp.eq.s32.totalorder %s518_s22, 1 }
  0x13   : > { %p911_p7 = por %p901_p3, %p101_p2  ;;  %p915_p8 = por %p155_p4, %p95_p0 }
  0x14   : > { %p919_p9 = por %p161_p6, %p101_p2  ;;  %p519_p10 = scmp.ge.s32.totalorder %s830_s20, 1 }
  0x15   : > { %p168_p11 = scmp.lt.s32.totalorder %s830_s20, 3  ;;  %s1060_s0 = sld [smem:[#allocation18_spill]] }
  0x16   : > { %p522_p13 = scmp.ge.s32.totalorder %s830_s20, 2  ;;  %p588_p0 = scmp.lt.s32.totalorder %s830_s20, 2 }
  0x17   : > { %p928_p12 = pnand %p519_p10, %p168_p11  ;;  %s1062_s1 = sld [smem:[#allocation19_spill]] }
  0x18   : > { %p941_p2 = pnand %p588_p0, %p905_p5  ;;  %s832_s11 = smov [#allocation2]  }
  0x19   : > { %p568_p1 = pneg %p928_p12  ;;  %s833_s12 = smov [#allocation6]  }
  0x1a   : > { %s37_s13 = sadd.s32 1, %s826_s19  ;;  %s949_s14 = sand.u32 1, %s818_s17  }
  0x1b   : > { %s180_s5 = sshll.u32 %s1060_s0, 4  ;;  %p569_p4 = pnand %p568_p1, %p901_p3  ;;  %s181_s5 = int_to_ptr.hbm [resolvable:$true] %s180_s5 }
  0x1c   : > { %p39_p6 = scmp.ge.s32.totalorder %s37_s13, 2  ;;  %s550_s21 = smul.u32 24, %s949_s14 }
  0x1d   : > { %s190_s9 = sshll.u32 %s1062_s1, 4  ;;  %s551_s22 = smul.u32 24, %s826_s19  ;;  %s191_s9 = int_to_ptr.hbm [resolvable:$true] %s190_s9 }
  0x1e   : > { %571 = dma.hbm_to_smem (!%p569_p4), %s181_s5, 64, %s832_s11, [#allocation5]  }
  0x1f   : > { %574 = dma.hbm_to_smem (!%p569_p4), %s191_s9, 16, %s833_s12, [#allocation7]  }
  0x20   : > { %s1073_s13 = smov (%p39_p6, %s37_s13), 0  ;;  %s205_s29 = scalar_lea.vmem [#allocation8], %s550_s21 }
  0x21   : > { %1064 = sst [smem:[#allocation17_spill]] %s1073_s13  ;;  %s83_s25 = ssub.s32 %s826_s19, %s1073_s13 }
  0x22   : > { %s214_s30 = sshll.u32 %s205_s29, 4  ;;  %p86_p5 = scmp.eq.s32.totalorder %s83_s25, 0  ;;  %s215_s30 = int_to_ptr.vmem [resolvable:$true] %s214_s30 }
  0x23   : > { %s1065_s2 = sld [smem:[#allocation20_spill]]  ;;  %s202_s12 = scalar_lea.sflag [#allocation3], %s949_s14 }
  0x24   : > { %s963_s11 = scalar_select %p86_p5, %s818_s17, %s88_s23  }
  0x25   : > { %s834_s0 = smov 128   ;;  %s835_s1 = smov 8  }
  0x26   : > { %s524_s21 = sshll.u32 %s949_s14, 3  ;;  %s525_s29 = sshll.u32 %s826_s19, 3 }
  0x27   : > { %s233_s5 = scalar_lea.hbm %s1049_s3, %s525_s29 }
  0x29   : > { %s211_s8 = scalar_lea.hbm %s1065_s2, %s551_s22  ;;  %s228_s22 = scalar_lea.vmem [#allocation9], %s524_s21 }
  0x2a   : > { %s212_s9 = sshll.u32 %s211_s8, 4  ;;  %s237_s7 = sshll.u32 %s228_s22, 4  ;;  %s213_s9 = int_to_ptr.hbm [resolvable:$true] %s212_s9  ;;  %s238_s7 = int_to_ptr.vmem [resolvable:$true] %s237_s7 }
  0x2b   : > { %578 = dma.hbm_to_vmem [thread:$0]  (!%p941_p2), %s213_s9, 384, %s215_s30, %s202_s12, %s834_s0, %s834_s0, %s835_s1  }
  0x2c   : > { %s235_s8 = sshll.u32 %s233_s5, 4  ;;  %s225_s2 = scalar_lea.sflag [#allocation10], %s949_s14  ;;  %s236_s8 = int_to_ptr.hbm [resolvable:$true] %s235_s8 }
  0x2d   : > { %581 = dma.hbm_to_vmem [thread:$0]  (!%p941_p2), %s236_s8, 128, %s238_s7, %s225_s2  }
  0x2e   : > { %246 = sbr.rel (%p928_p12) target bundleno = 97 (0x61), region = 36 }
  0x33   : > { %789 = dma.done.wait (%p901_p3), [#allocation5], 64  }
  0x34   : > { %791 = vsyncadd (%p901_p3), [#allocation5], 4294967232 }
  0x35   : > { %793 = dma.done.wait (%p901_p3), [#allocation7], 16  }
  0x36   : > { %795 = vsyncadd (%p901_p3), [#allocation7], 4294967280  ;;  %s987_s0 = sand.u32 1, %s814_s16  }
  0x37   : > { %s552_s1 = smul.u32 24, %s987_s0  ;;  %s259_s2 = scalar_lea.sflag [#allocation3], %s987_s0 }
  0x39   : > { %s262_s23 = scalar_lea.vmem [#allocation8], %s552_s1 }
  0x3a   : > { %797 = dma.done.wait (%p911_p7), %s259_s2, 384  }
  0x3b   : > { %799 = vsyncadd (%p911_p7), %s259_s2, 4294966912  ;;  %s529_s24 = sshll.u32 %s987_s0, 3  ;;  %s269_s6 = scalar_lea.sflag [#allocation10], %s987_s0 }
  0x3c   : > { %s272_s10 = scalar_lea.vmem [#allocation9], %s529_s24 }
  0x3d   : > { %801 = dma.done.wait (%p911_p7), %s269_s6, 128  }
  0x3e   : > { %803 = vsyncadd (%p911_p7), %s269_s6, 4294967168 }
  0x3f   : > { %278 = sfence }
  0x40   : > { %s304_s13 = sld [smem:[#allocation2]]  ;;  %v319_v0 = vld [vmem:[%s262_s23] sm:$0xff]  ;;  %v543_v1 = vld [vmem:[%s262_s23 + $0x8] sm:$0xff]  ;;  %v544_v5 = vld [vmem:[%s262_s23 + $0x10] sm:$0xff]  ;;  %s553_s24 = smul.u32 24, %s822_s18 }
  0x41   : > { %s530_s14 = sld [smem:[#allocation2 + $0x1]]  ;;  %v324_v8 = vld [vmem:[%s272_s10] sm:$0xff]  ;;  %s303_s6 = scalar_lea.vmem [#allocation11], %s552_s1 }
  0x42   : > { %s531_s30 = sld [smem:[#allocation2 + $0x2]]  ;;  %s370_s1 = scalar_lea.sflag [#allocation4], %s987_s0 }
  0x43   : > { %s532_s9 = sld [smem:[#allocation2 + $0x3]] }
  0x44   : > { %s316_s12 = sld [smem:[#allocation6]] }
  0x45   : > { %s533_s21 = sld [smem:[#allocation2 + $0x80]] }
  0x46   : > { %v325_v2 = vstv %s304_s13  ;;  %s534_s29 = sld [smem:[#allocation2 + $0x81]] }
  0x47   : > { %v326_v3 = vmul.f32 %v325_v2, %v319_v0  ;;  %v329_v4 = vstv %s530_s14  ;;  %s535_s25 = sld [smem:[#allocation2 + $0x82]]  ;;  %s382_s14 = scalar_lea.hbm %s1050_s4, %s553_s24 }
  0x48   : > { %v332_v6 = vstv %s531_s30  ;;  %s1003_s5 = sld [smem:[#allocation2 + $0x83]]  ;;  %v330_v7 = vmul.f32 %v543_v1, %v329_v4  ;;  %s383_s30 = sshll.u32 %s303_s6, 4  ;;  %s384_s30 = int_to_ptr.vmem [resolvable:$true] %s383_s30 }
  0x49   : > { %s541_s26 = sld [smem:[#allocation6 + $0x1]]  ;;  %v335_v10 = vstv %s532_s9  ;;  %v333_v12 = vmul.f32 %v544_v5, %v332_v6  ;;  %s385_s18 = sshll.u32 %s382_s14, 4  ;;  %s386_s18 = int_to_ptr.hbm [resolvable:$true] %s385_s18 }
  0x4a   : > { %v327_v9 = vstv %s316_s12  ;;  %s537_s22 = sld [smem:[#allocation2 + $0x100]]  ;;  %v336_v17 = vmul.f32 %v335_v10, %v324_v8  ;;  %s750_s9 = sshra.s32 %s386_s18, 4  ;;  %s751_s9 = int_to_ptr.hbm [resolvable:$true] %s750_s9 }
  0x4b   : > { %v328_v11 = vadd.f32 %v327_v9, %v326_v3  ;;  %v339_v13 = vstv %s533_s21  ;;  %s538_s7 = sld [smem:[#allocation2 + $0x101]]  ;;  %s752_s12 = scalar_lea.hbm %s751_s9, 24 }
  0x4c   : > { %v340_v14 = vmul.f32 %v339_v13, %v319_v0  ;;  %v343_v15 = vstv %s534_s29  ;;  %s539_s8 = sld [smem:[#allocation2 + $0x102]]  ;;  %p753_p3 = scmp.ne.s32.totalorder %s751_s9, %s752_s12 }
  0x4d   : > { %v331_v16 = vadd.f32 %v330_v7, %v328_v11  ;;  %v346_v18 = vstv %s535_s25  ;;  %s540_s2 = sld [smem:[#allocation2 + $0x103]]  ;;  %v344_v19 = vmul.f32 %v543_v1, %v343_v15  ;;  %s756_s25 = scalar_lea.hbm %s1050_s4, 48 }
  0x4e   : > { %s542_s23 = sld [smem:[#allocation6 + $0x2]]  ;;  %v349_v22 = vstv %s1003_s5  ;;  %v347_v24 = vmul.f32 %v544_v5, %v346_v18  ;;  %p754_p7 = pnand %p753_p3, %p915_p8 }
  0x4f   : > { %v334_v20 = vadd.f32 %v333_v12, %v331_v16  ;;  %v341_v21 = vstv %s541_s26  ;;  %v350_v30 = vmul.f32 %v349_v22, %v324_v8  ;;  %p757_p11 = scmp.lt.s32.totalorder %s751_s9, %s1050_s4  ;;  %p758_p12 = scmp.lt.s32.totalorder %s756_s25, %s752_s12 }
  0x50   : > { %v342_v23 = vadd.f32 %v341_v21, %v340_v14  ;;  %v354_v25 = vstv %s537_s22  ;;  %p755_p10 = pneg %p754_p7 }
  0x51   : > { %v337_v26 = vadd.f32 %v336_v17, %v334_v20  ;;  %v355_v27 = vmul.f32 %v354_v25, %v319_v0  ;;  %v358_v28 = vstv %s538_s7  ;;  %p759_p0 = por %p758_p12, %p757_p11 }
  0x52   : > { %v345_v29 = vadd.f32 %v344_v19, %v342_v23  ;;  %v361_v31 = vstv %s539_s8  ;;  %v359_v32 = vmul.f32 %v543_v1, %v358_v28 }
  0x53   : > { %338 = vst [vmem:[%s303_s6] sm:$0xff] %v337_v26  ;;  %v364_v35 = vstv %s540_s2  ;;  %v362_v37 = vmul.f32 %v544_v5, %v361_v31  ;;  %p760_p1 = pnand %p759_p0, %p755_p10 }
  0x54   : > { %v348_v33 = vadd.f32 %v347_v24, %v345_v29  ;;  %v356_v34 = vstv %s542_s23  ;;  %v365_v40 = vmul.f32 %v364_v35, %v324_v8 }
  0x55   : > { %v357_v36 = vadd.f32 %v356_v34, %v355_v27 }
  0x56   : > { %v351_v38 = vadd.f32 %v350_v30, %v348_v33 }
  0x57   : > { %v360_v39 = vadd.f32 %v359_v32, %v357_v36 }
  0x58   : > { %545 = vst [vmem:[%s303_s6 + $0x8] sm:$0xff] %v351_v38 }
  0x59   : > { %v363_v41 = vadd.f32 %v362_v37, %v360_v39 }
  0x5b   : > { %v366_v42 = vadd.f32 %v365_v40, %v363_v41 }
  0x5d   : > { %546 = vst [vmem:[%s303_s6 + $0x10] sm:$0xff] %v366_v42 }
  0x5e   : > { %763 = shalt.err (!%p760_p1)
}
  0x5f   : > { %s836_s0 = smov 128   ;;  %s837_s22 = smov 8  }
  0x60   : > { %566 = dma.vmem_to_hbm [thread:$0]  (%p915_p8), %s384_s30, 384, %s386_s18, %s370_s1, %s836_s0, %s836_s0, %s837_s22  }
  0x61 PF: > { %s400_s7 = sand.u32 1, %s810_s15   ;;  %p583_p2 = pnand %p522_p13, %p919_p9 }
  0x62   : > { %s401_s8 = scalar_lea.sflag [#allocation4], %s400_s7 }
  0x63   : > { %p584_p4 = pneg %p583_p2 }
  0x65   : > { %805 = dma.done.wait (%p584_p4), %s401_s8, 384  }
  0x66   : > { %807 = vsyncadd (%p584_p4), %s401_s8, 4294966912  ;;  %s25_s20 = sadd.s32 1, %s830_s20   ;;  %s1066_s27 = sld [smem:[#allocation17_spill]] }
  0x67   : > { %p22_p6 = scmp.ge.s32.totalorder %s25_s20, 4   ;;  %s1067_s15 = smov %s814_s16 }
  0x68   : > { %s1068_s16 = smov %s818_s17  ;;  %s1069_s17 = smov %s963_s11 }
  0x69   : > { %s1070_s18 = smov %s826_s19  ;;  %24 = sbr.rel (!%p22_p6) target bundleno = 14 (0xe), region = 107 }
  0x6c   : > { %s1071_s19 = smov %s1066_s27 }
  0x6e   :  { %407 = vsyncpa [#allocation3], 1 }
  0x6f   :  { %409 = vsyncpa [#allocation3 + $0x1], 1 }
  0x70   :  { %410 = vsyncpa [#allocation10], 1 }
  0x71   :  { %412 = vsyncpa [#allocation10 + $0x1], 1 }
  0x72   :  { %413 = vsyncpa [#allocation4], 1 }
  0x73   :  { %415 = vsyncpa [#allocation4 + $0x1], 1 }
  0x74   :  { %416 = vsyncpa [#allocation5], 1 }
  0x75   :  { %418 = vsyncpa [#allocation5 + $0x1], 1 }
  0x76   :  { %419 = vsyncpa [#allocation7], 1 }

</bundles_post_ra>
